<compile_context>
chip_gen: v7x
topology: tpu7x:2x2x1
jax: 0.10.0
libtpu: 0.0.40
codegen_flags: <defaults>
</compile_context>

<pallas_src>
import functools

import jax
import jax.numpy as jnp
from jax.experimental import pallas as pl
from jax.experimental.pallas import tpu as pltpu


_LANE = 128
_NEG_INF = float("-inf")
_TARGET_BLOCK_BYTES = 2 * 1024 * 1024       # aim for ~2 MiB input blocks
_FUSED_MAX_BLOCK_VMEM = 24 * 1024 * 1024    # 2 bufs x (in+out) budget, v7x-safe


def _vmem_limit(nbytes):
    """Scoped-VMEM limit: estimated need + ~30% headroom, clamped sanely."""
    limit = int(nbytes * 1.3) + (2 << 20)
    return max(16 << 20, min(64 << 20, limit))


def _pad_spatial(x2, s, mult):
    """Pad the (lane) spatial axis of (N, C, S) up to a multiple of `mult`."""
    s_pad = -(-s // mult) * mult
    if s_pad == s:
        return x2, s
    return jnp.pad(x2, ((0, 0), (0, 0), (0, s_pad - s))), s_pad


def _choose_spatial_tile(s, c, itemsize, target_bytes):
    """Pick a lane-dense spatial tile (multiple of 128) of roughly target size."""
    max_lanes = max(_LANE, (target_bytes // max(c * itemsize, 1)) // _LANE * _LANE)
    if s % _LANE == 0:
        k = s // _LANE
        best = _LANE
        for d in range(1, k + 1):
            if k % d == 0 and _LANE * d <= max_lanes:
                best = _LANE * d
        return best
    return min(max_lanes, -(-s // _LANE) * _LANE)


# ---------------------------------------------------------------------------
# Fused single-pass kernel: pool + MLP gate + scale over one (NB, C, S) block.
# ---------------------------------------------------------------------------
def _fused_kernel(x_ref, w1_ref, w2_ref, out_ref, *, s_valid):
    """x_ref/out_ref: (NB, C, S_pad); w1_ref: (Cr, C); w2_ref: (C, Cr)."""
    nb, c, s_pad = x_ref.shape

    # Global pooling: lane reductions.  Cast to f32 *inside* each reduction and
    # re-read x_ref per sweep so no full-slab f32 temporary stays live.
    avg = jnp.sum(x_ref[...].astype(jnp.float32), axis=-1) * (1.0 / s_valid)

    if s_pad != s_valid:   # spatial axis was zero-padded -> mask for max
        lane = jax.lax.broadcasted_iota(jnp.int32, (nb, c, s_pad), 2)
        x_m = jnp.where(lane < s_valid, x_ref[...].astype(jnp.float32), _NEG_INF)
    else:
        x_m = x_ref[...].astype(jnp.float32)
    mx = jnp.max(x_m, axis=-1)                                   # (NB, C)

    # Shared MLP on the stacked [avg; max] columns: one matmul chain.
    p = jnp.concatenate([avg, mx], axis=0)                       # (2*NB, C)
    w1 = w1_ref[...].astype(jnp.float32)                         # (Cr, C)
    w2 = w2_ref[...].astype(jnp.float32)                         # (C, Cr)
    h = jax.lax.dot_general(p, w1, (((1,), (1,)), ((), ())),
                            preferred_element_type=jnp.float32)  # (2NB, Cr)
    h = jnp.maximum(h, 0.0)
    y = jax.lax.dot_general(h, w2, (((1,), (1,)), ((), ())),
                            preferred_element_type=jnp.float32)  # (2NB, C)
    gate = jax.nn.sigmoid(y[:nb] + y[nb:])                       # (NB, C)
    gate = gate[:, :, None].astype(out_ref.dtype)

    out_ref[...] = x_ref[...] * gate


# ---------------------------------------------------------------------------
# Two-pass path (large slabs): pass 1 = pooling + gate, pass 2 = tiled scale.
# ---------------------------------------------------------------------------
def _pool_gate_kernel(x_ref, w1_ref, w2_ref, gate_ref, sum_sc, max_sc, *,
                      s_valid, masked):
    """x_ref: (C, TS) spatial tile; gate_ref: (C, 1) f32; scratch: (C, 1) f32."""
    s_idx = pl.program_id(1)

    @pl.when(s_idx == 0)
    def _init():
        sum_sc[...] = jnp.zeros_like(sum_sc)
        max_sc[...] = jnp.full_like(max_sc, _NEG_INF)

    c, ts = x_ref.shape
    sum_sc[...] += jnp.sum(x_ref[...].astype(jnp.float32), axis=-1, keepdims=True)

    if masked:   # last tile may contain zero-padding -> mask before max
        lane = jax.lax.broadcasted_iota(jnp.int32, (c, ts), 1)
        x_m = jnp.where(s_idx * ts + lane < s_valid,
                        x_ref[...].astype(jnp.float32), _NEG_INF)
    else:
        x_m = x_ref[...].astype(jnp.float32)
    max_sc[...] = jnp.maximum(max_sc[...], jnp.max(x_m, axis=-1, keepdims=True))

    @pl.when(s_idx == pl.num_programs(1) - 1)
    def _finalize():
        avg = sum_sc[...] * (1.0 / s_valid)                      # (C, 1)
        p = jnp.concatenate([avg, max_sc[...]], axis=1)          # (C, 2)
        w1 = w1_ref[...].astype(jnp.float32)                     # (Cr, C)
        w2 = w2_ref[...].astype(jnp.float32)                     # (C, Cr)
        h = jnp.maximum(jnp.dot(w1, p, preferred_element_type=jnp.float32), 0.0)
        y = jnp.dot(w2, h, preferred_element_type=jnp.float32)   # (C, 2)
        gate_ref[...] = jax.nn.sigmoid(y[:, 0:1] + y[:, 1:2])    # (C, 1)


def _scale_kernel(gate_ref, x_ref, out_ref):
    """gate_ref: (C, 1) f32; x_ref/out_ref: (C, TS)."""
    out_ref[...] = x_ref[...] * gate_ref[...].astype(out_ref.dtype)


# ---------------------------------------------------------------------------
# Wrappers
# ---------------------------------------------------------------------------
def _channel_attention_fused(x2, w1m, w2m, n, c, cr, s, itemsize):
    x2p, s_pad = _pad_spatial(x2, s, _LANE)         # lane-dense output stores
    slab_bytes = c * s_pad * itemsize               # one batch element (input)

    # Batch packing: a few MiB per block, >= min(N, 8) grid steps, NB | N,
    # and 2x(in+out) double-buffered blocks within the fused VMEM budget.
    nb = max(1, min(n, _TARGET_BLOCK_BYTES // max(slab_bytes, 1)))
    nb = min(nb, max(1, n // min(n, 8)))
    nb = max(1, min(nb, _FUSED_MAX_BLOCK_VMEM // max(4 * slab_bytes, 1)))
    while n % nb:
        nb -= 1

    vmem_need = 4 * nb * c * s_pad * itemsize + 2 * c * cr * 4

    out2p = pl.pallas_call(
        functools.partial(_fused_kernel, s_valid=s),
        out_shape=jax.ShapeDtypeStruct((n, c, s_pad), x2.dtype),
        grid_spec=pltpu.PrefetchScalarGridSpec(
            num_scalar_prefetch=0,
            grid=(n // nb,),
            in_specs=[
                pl.BlockSpec((nb, c, s_pad), lambda i: (i, 0, 0)),
                # Weights: constant block index -> stay resident, no re-DMA.
                pl.BlockSpec((cr, c), lambda i: (0, 0)),
                pl.BlockSpec((c, cr), lambda i: (0, 0)),
            ],
            out_specs=pl.BlockSpec((nb, c, s_pad), lambda i: (i, 0, 0)),
        ),
        compiler_params=pltpu.CompilerParams(
            dimension_semantics=("parallel",),
            vmem_limit_bytes=_vmem_limit(vmem_need)),
        cost_estimate=pl.CostEstimate(
            flops=int(n * (3 * c * s + 8 * c * cr)),
            transcendentals=int(n * c),
            bytes_accessed=int(2 * n * c * s_pad * itemsize + 2 * c * cr * 4)),
    )(x2p, w1m, w2m)

    if s_pad != s:
        out2p = out2p[:, :, :s]
    return out2p


def _channel_attention_two_pass(x2, w1m, w2m, n, c, cr, s, itemsize, tile_bytes):
    ts = _choose_spatial_tile(s, c, itemsize, tile_bytes)
    x2p, s_pad = _pad_spatial(x2, s, ts)
    n_tiles = s_pad // ts
    masked = (s_pad != s)

    # -------- pass 1: pooled stats + MLP gate -> (N, C, 1) f32 --------
    pool_vmem = 2 * c * ts * itemsize + 2 * c * cr * 4 + 6 * c * 4
    gate = pl.pallas_call(
        functools.partial(_pool_gate_kernel, s_valid=s, masked=masked),
        out_shape=jax.ShapeDtypeStruct((n, c, 1), jnp.float32),
        grid_spec=pltpu.PrefetchScalarGridSpec(
            num_scalar_prefetch=0,
            grid=(n, n_tiles),
            in_specs=[
                pl.BlockSpec((pl.Squeezed(), c, ts), lambda i, j: (i, 0, j)),
                pl.BlockSpec((cr, c), lambda i, j: (0, 0)),
                pl.BlockSpec((c, cr), lambda i, j: (0, 0)),
            ],
            out_specs=pl.BlockSpec((pl.Squeezed(), c, 1), lambda i, j: (i, 0, 0)),
            scratch_shapes=[pltpu.VMEM((c, 1), jnp.float32),
                            pltpu.VMEM((c, 1), jnp.float32)],
        ),
        compiler_params=pltpu.CompilerParams(
            dimension_semantics=("parallel", "arbitrary"),
            vmem_limit_bytes=_vmem_limit(pool_vmem)),
        cost_estimate=pl.CostEstimate(
            flops=int(n * (2 * c * s + 8 * c * cr)),
            transcendentals=int(n * c),
            bytes_accessed=int(n * c * s_pad * itemsize + n * c * 4
                               + 2 * c * cr * 4)),
    )(x2p, w1m, w2m)

    # -------- pass 2: tiled broadcast-scale --------
    scale_vmem = 4 * c * ts * itemsize + 2 * c * 4
    out2p = pl.pallas_call(
        _scale_kernel,
        out_shape=jax.ShapeDtypeStruct((n, c, s_pad), x2.dtype),
        grid_spec=pltpu.PrefetchScalarGridSpec(
            num_scalar_prefetch=0,
            grid=(n, n_tiles),
            in_specs=[
                pl.BlockSpec((pl.Squeezed(), c, 1), lambda i, j: (i, 0, 0)),
                pl.BlockSpec((pl.Squeezed(), c, ts), lambda i, j: (i, 0, j)),
            ],
            out_specs=pl.BlockSpec((pl.Squeezed(), c, ts), lambda i, j: (i, 0, j)),
        ),
        compiler_params=pltpu.CompilerParams(
            dimension_semantics=("parallel", "parallel"),
            vmem_limit_bytes=_vmem_limit(scale_vmem)),
        cost_estimate=pl.CostEstimate(
            flops=int(n * c * s),
            transcendentals=0,
            bytes_accessed=int(2 * n * c * s_pad * itemsize + n * c * 4)),
    )(gate, x2p)

    if s_pad != s:
        out2p = out2p[:, :, :s]
    return out2p


@functools.partial(jax.jit, static_argnames=("force_two_pass", "spatial_tile_bytes"))
def channel_attention(x, w1, w2, *, force_two_pass=False,
                      spatial_tile_bytes=_TARGET_BLOCK_BYTES):
    """x: (N, C, D, H, W); w1: (C//r, C, 1, 1, 1); w2: (C, C//r, 1, 1, 1)."""
    n, c, d, h, w = x.shape
    cr = w1.shape[0]
    s = d * h * w
    itemsize = x.dtype.itemsize

    x2 = x.reshape(n, c, s)       # contiguous view (spatial dims already last)
    w1m = w1.reshape(cr, c)
    w2m = w2.reshape(c, cr)

    slab_bytes = c * s * itemsize
    use_fused = (not force_two_pass) and (4 * slab_bytes <= _FUSED_MAX_BLOCK_VMEM)

    if use_fused:
        out2 = _channel_attention_fused(x2, w1m, w2m, n, c, cr, s, itemsize)
    else:
        out2 = _channel_attention_two_pass(x2, w1m, w2m, n, c, cr, s, itemsize,
                                           spatial_tile_bytes)
    return out2.reshape(n, c, d, h, w)


def _reference(x, w1, w2):
    """Pure-JAX reference matching the PyTorch forward."""
    n, c = x.shape[:2]
    cr = w1.shape[0]
    xr = x.reshape(n, c, -1)
    avg = jnp.mean(xr, axis=2)                               # (N, C)
    mx = jnp.max(xr, axis=2)                                 # (N, C)
    w1m = w1.reshape(cr, c)
    w2m = w2.reshape(c, cr)

    def mlp(p):
        h = jnp.maximum(p @ w1m.T, 0.0)
        return h @ w2m.T

    gate = jax.nn.sigmoid(mlp(avg) + mlp(mx))                # (N, C)
    return x * gate[:, :, None, None, None]


if __name__ == "__main__":
    key = jax.random.PRNGKey(0)
    RATIO = 8

    def make_inputs(k, n, c, d, h, w):
        cr = max(1, c // RATIO)
        kx, k1, k2 = jax.random.split(k, 3)
        x = jax.random.normal(kx, (n, c, d, h, w), dtype=jnp.float32)
        std1 = (2.0 / c) ** 0.5
        std2 = (2.0 / cr) ** 0.5
        w1 = std1 * jax.random.normal(k1, (cr, c, 1, 1, 1), dtype=jnp.float32)
        w2 = std2 * jax.random.normal(k2, (c, cr, 1, 1, 1), dtype=jnp.float32)
        return x, w1, w2

    cases = [
        # (shape,               force_two_pass, spatial_tile_bytes)
        ((2, 16, 4, 8, 8),      False, _TARGET_BLOCK_BYTES),  # fused, S=256 aligned
        ((2, 16, 3, 5, 7),      False, _TARGET_BLOCK_BYTES),  # fused, S=105 -> padded/masked
        ((2, 16, 4, 8, 16),     True,  16 * 128 * 4),         # two-pass, 4 spatial tiles
        ((2, 16, 3, 5, 7),      True,  16 * 128 * 4),         # two-pass, padded/masked tail
    ]

    for i, (shape, force, tile_bytes) in enumerate(cases):
        key, sub = jax.random.split(key)
        x, w1, w2 = make_inputs(sub, *shape)
        out = channel_attention(x, w1, w2, force_two_pass=force,
                                spatial_tile_bytes=tile_bytes)
        out = jax.block_until_ready(out)
        ref = _reference(x, w1, w2)
        assert out.shape == x.shape, f"shape mismatch in case {i}"
        assert jnp.allclose(out, ref, atol=1e-4, rtol=1e-4), f"mismatch in case {i}"

    print("KERNEL_OK")
</pallas_src>

<mosaic_0001>
module attributes {stable_mosaic.version = 11 : i64} {
  func.func @_fused_kernel(%arg0: i32, %arg1: memref<1x16x256xf32, #tpu.memory_space<vmem>>, %arg2: memref<2x16xf32, #tpu.memory_space<vmem>>, %arg3: memref<16x2xf32, #tpu.memory_space<vmem>>, %arg4: memref<1x16x256xf32, #tpu.memory_space<vmem>>) attributes {dimension_semantics = [#tpu.dimension_semantics<parallel>], iteration_bounds = array<i64: 2>, scalar_prefetch = 0 : i64, scratch_operands = 0 : i64, tpu.core_type = #tpu.core_type<tc>, window_params = [{transform_indices = @transform_0, window_bounds = array<i64: 1, 16, 256>}, {pipeline_mode = #tpu.pipeline_mode<synchronous>, transform_indices = @transform_1, window_bounds = array<i64: 2, 16>}, {pipeline_mode = #tpu.pipeline_mode<synchronous>, transform_indices = @transform_2, window_bounds = array<i64: 16, 2>}, {transform_indices = @transform_3, window_bounds = array<i64: 1, 16, 256>}]} {
    %c0 = arith.constant 0 : index
    %c0_0 = arith.constant 0 : index
    %c0_1 = arith.constant 0 : index
    %0 = vector.load %arg1[%c0, %c0_0, %c0_1] : memref<1x16x256xf32, #tpu.memory_space<vmem>>, vector<1x16x256xf32>
    %cst = arith.constant dense<0.000000e+00> : vector<1x16xf32>
    %1 = vector.multi_reduction <add>, %0, %cst [2] : vector<1x16x256xf32> to vector<1x16xf32>
    %cst_2 = arith.constant 3.906250e-03 : f32
    %2 = vector.broadcast %cst_2 : f32 to vector<1x16xf32>
    %3 = arith.mulf %1, %2 : vector<1x16xf32>
    %c0_3 = arith.constant 0 : index
    %c0_4 = arith.constant 0 : index
    %c0_5 = arith.constant 0 : index
    %4 = vector.load %arg1[%c0_3, %c0_4, %c0_5] : memref<1x16x256xf32, #tpu.memory_space<vmem>>, vector<1x16x256xf32>
    %cst_6 = arith.constant dense<0xFF800000> : vector<1x16xf32>
    %5 = vector.multi_reduction <maximumf>, %4, %cst_6 [2] : vector<1x16x256xf32> to vector<1x16xf32>
    %6 = tpu.concatenate %3, %5 in 0 : vector<1x16xf32>, vector<1x16xf32> -> vector<2x16xf32>
    %c0_7 = arith.constant 0 : index
    %c0_8 = arith.constant 0 : index
    %7 = vector.load %arg2[%c0_7, %c0_8] : memref<2x16xf32, #tpu.memory_space<vmem>>, vector<2x16xf32>
    %c0_9 = arith.constant 0 : index
    %c0_10 = arith.constant 0 : index
    %8 = vector.load %arg3[%c0_9, %c0_10] : memref<16x2xf32, #tpu.memory_space<vmem>>, vector<16x2xf32>
    %cst_11 = arith.constant dense<0.000000e+00> : vector<2x2xf32>
    %9 = tpu.matmul %6, %7, %cst_11 {dimension_numbers = #tpu.dot_dimension_numbers<[1], [1], [0], [0], [0, 0, 1, 0], [], []>} : vector<2x16xf32>, vector<2x16xf32>, vector<2x2xf32> -> vector<2x2xf32>
    %cst_12 = arith.constant 0.000000e+00 : f32
    %10 = vector.broadcast %cst_12 : f32 to vector<2x2xf32>
    %11 = arith.maximumf %9, %10 : vector<2x2xf32>
    %cst_13 = arith.constant dense<0.000000e+00> : vector<2x16xf32>
    %12 = tpu.matmul %11, %8, %cst_13 {dimension_numbers = #tpu.dot_dimension_numbers<[1], [1], [0], [0], [0, 0, 1, 0], [], []>} : vector<2x2xf32>, vector<16x2xf32>, vector<2x16xf32> -> vector<2x16xf32>
    %13 = vector.extract_strided_slice %12 {offsets = [0, 0], sizes = [1, 16], strides = [1, 1]} : vector<2x16xf32> to vector<1x16xf32>
    %14 = vector.extract_strided_slice %12 {offsets = [1, 0], sizes = [1, 16], strides = [1, 1]} : vector<2x16xf32> to vector<1x16xf32>
    %15 = arith.addf %13, %14 : vector<1x16xf32>
    %16 = arith.negf %15 : vector<1x16xf32>
    %17 = math.exp %16 : vector<1x16xf32>
    %cst_14 = arith.constant 1.000000e+00 : f32
    %18 = vector.broadcast %cst_14 : f32 to vector<1x16xf32>
    %19 = arith.addf %18, %17 : vector<1x16xf32>
    %20 = arith.divf %18, %19 : vector<1x16xf32>
    %21 = vector.shape_cast %20 : vector<1x16xf32> to vector<1x16x1xf32>
    %c0_15 = arith.constant 0 : index
    %c0_16 = arith.constant 0 : index
    %c0_17 = arith.constant 0 : index
    %22 = vector.load %arg1[%c0_15, %c0_16, %c0_17] : memref<1x16x256xf32, #tpu.memory_space<vmem>>, vector<1x16x256xf32>
    %23 = vector.broadcast %21 : vector<1x16x1xf32> to vector<1x16x256xf32>
    %24 = arith.mulf %22, %23 : vector<1x16x256xf32>
    %c0_18 = arith.constant 0 : index
    %c0_19 = arith.constant 0 : index
    %c0_20 = arith.constant 0 : index
    %25 = vector.load %arg4[%c0_18, %c0_19, %c0_20] : memref<1x16x256xf32, #tpu.memory_space<vmem>>, vector<1x16x256xf32>
    tpu.vector_store %arg4[%c0_18, %c0_19, %c0_20], %24 {strides = array<i32>} : memref<1x16x256xf32, #tpu.memory_space<vmem>>, vector<1x16x256xf32>,
    return
  }
  func.func @transform_0(%arg0: i32) -> (i32, i32, i32) {
    %c0_i32 = arith.constant 0 : i32
    %c0_i32_0 = arith.constant 0 : i32
    %c0_i32_1 = arith.constant 0 : i32
    return %arg0, %c0_i32, %c0_i32_0 : i32, i32, i32
  }
  func.func @transform_1(%arg0: i32) -> (i32, i32) {
    %c0_i32 = arith.constant 0 : i32
    %c0_i32_0 = arith.constant 0 : i32
    %c0_i32_1 = arith.constant 0 : i32
    return %c0_i32, %c0_i32_0 : i32, i32
  }
  func.func @transform_2(%arg0: i32) -> (i32, i32) {
    %c0_i32 = arith.constant 0 : i32
    %c0_i32_0 = arith.constant 0 : i32
    %c0_i32_1 = arith.constant 0 : i32
    return %c0_i32, %c0_i32_0 : i32, i32
  }
  func.func @transform_3(%arg0: i32) -> (i32, i32, i32) {
    %c0_i32 = arith.constant 0 : i32
    %c0_i32_0 = arith.constant 0 : i32
    %c0_i32_1 = arith.constant 0 : i32
    return %arg0, %c0_i32, %c0_i32_0 : i32, i32, i32
  }
}

</mosaic_0001>

<bundles_post_ra>
// kernel: channel_attention.1
= control target key start
LH: loop header
LB: loop body
LE: loop exit
PB: predicated region body
PF: predicated region fallthrough
CT: control target
= control target key end

     0   :  { %s550_s12 = smov 0   ;;  %s608_s0 = inlined_call_operand.vmem [shape: f32[2,16,256], index: 0, kind: input, shape index: {}]   ;;  %s609_s1 = inlined_call_operand.vmem [shape: f32[2,16], index: 1, kind: input, shape index: {}]   ;;  %s610_s2 = inlined_call_operand.vmem [shape: f32[16,2], index: 2, kind: input, shape index: {}]   ;;  %s611_s3 = inlined_call_operand.vmem [shape: f32[2,16,256], index: 3, kind: output, shape index: {}]  }
   0x1 LB: > { %s464_s13 = sadd.s32 4294967295, %s525_s12   ;;  %p468_p0 = scmp.ge.s32.totalorder %s525_s12, 1  ;;  %s525_s12 = sphi %s550_s12, %s13_s12  }
   0x2   : > { %p137_p1 = scmp.lt.s32.totalorder %s525_s12, 3 }
   0x4   : > { %p138_p2 = pnand %p468_p0, %p137_p1 }
   0x5   : > { %p161_p3 = scmp.lt.s32.totalorder (!%p138_p2), %s464_s13, 1  ;;  %v527_v8 = vmov (!%p138_p2), 0.0   ;;  %v219_v9 = vld [vmem:[%s609_s1] sm:$0x3] (!%p138_p2)  ;;  %vm222_vm0 = vcmask (!%p138_p2), 130048   ;;  %vm528_vm1 = vmmov (!%p138_p2), 0   ;;  %v191_v14 = vlaneseq (!%p138_p2) }
   0x6   : > { %141 = sbr.rel (%p138_p2) target bundleno = 748 (0x2ec), region = 32  ;;  %488 = vmatprep.subr.mxu0 (!%p138_p2), %v527_v8  ;;  %490 = vmatprep.mubr.msk.f32.mxu0 (!%p138_p2), %vm528_vm1, %v527_v8  ;;  %v220_v10 = vld [vmem:[%s610_s2] sm:$0xff] (!%p138_p2)  ;;  %v221_v11 = vld [vmem:[%s610_s2 + $0x8] sm:$0xff] (!%p138_p2)  ;;  %vm300_vm2 = vcmask (!%p138_p2), 15360   ;;  %v529_v12 = vmov (!%p138_p2), 0.0|0.0   ;;  %vm202_vm4 = vcmask (!%p138_p2), 130112  }
   0x7   : > { %489 = vmatpush3.xpose.msk.msra.mxu0 (!%p138_p2), %vm222_vm0, %v219_v9  ;;  %497 = vmatprep.mubr.msk.f32.mxu1 (!%p138_p2), %vm528_vm1, %v527_v8  ;;  %v501_v13 = vpack.c.bf16 (!%p138_p2), %v221_v11, %v220_v10  ;;  %vm502_vm3 = vmpackc.low (!%p138_p2), %vm300_vm2, %vm300_vm2  ;;  %v192_v15 = vand.u32 (!%p138_p2), 127, %v191_v14  ;;  %v194_v17 = vshrl.u32 (!%p138_p2), %v191_v14, 7  ;;  %vm217_vm5 = vcmask (!%p138_p2), 1040384  }
   0x8   : > { %500 = vmatprep.subr.bf16.mxu1 (!%p138_p2), %v529_v12 }
   0x9   : > { %503 = vmatpush3.bf16.xpose.msk.msra.mxu1 (!%p138_p2), %vm502_vm3, %v501_v13  ;;  %v197_v16 = vadd.s32 (!%p138_p2), 4294967288, %v192_v15  ;;  %v195_v21 = vsub.s32 (!%p138_p2), %v192_v15, %v194_v17  ;;  %v392_v43 = vsub.s32 (!%p138_p2), 0, %v194_v17 }
   0xb   : > { %v200_v20 = vsub.s32 (!%p138_p2), %v197_v16, %v194_v17 }
   0xd   : > { %s613_s13 = smov (!%p161_p3, %s464_s13), 1 }
   0xe   : > { %s481_s14 = sshll.u32 %s613_s13, 5 }
   0xf   : > { %s165_s17 = scalar_lea.vmem %s608_s0, %s481_s14  ;;  %s170_s26 = scalar_lea.vmem %s611_s3, %s481_s14 }
  0x10   : > { %v566_v0 = vld [vmem:[%s165_s17] sm:$0xff]  ;;  %v568_v1 = vld [vmem:[%s165_s17 + $0x8] sm:$0xff]  ;;  %v570_v2 = vld [vmem:[%s165_s17 + $0x10] sm:$0xff] }
  0x11   : > { %v183_v3 = vmax.f32 %v566_v0, %v568_v1  ;;  %v175_v4 = vadd.f32 %v568_v1, %v566_v0  ;;  %v576_v5 = vld [vmem:[%s165_s17 + $0x18] sm:$0xff] }
  0x12   : > { %v186_v6 = vmax.f32 %v570_v2, %v576_v5  ;;  %v178_v7 = vadd.f32 %v576_v5, %v570_v2 }
  0x13   : > { %184 = vmax.xlane.f32.xlu1 %v183_v3  ;;  %176 = vadd.xlane.f32.xlu0 %v175_v4 }
  0x17   : > { %187 = vmax.xlane.f32.xlu1 %v186_v6  ;;  %179 = vadd.xlane.f32.xlu0 %v178_v7 }
  0xa0   : > { %v185_v18 = vpop.xlane.xlu1 %184  ;;  %v177_v19 = vpop.xlane.xlu0 %176 }
  0xa1   : > { %v181_v22 = vmul.f32 0.00390625, %v177_v19  ;;  %v210_v27 = vrot.slane %v185_v18, %v195_v21 }
  0xa3   : > { %v196_v28 = vrot.slane %v181_v22, %v195_v21 }
  0xa4   : > { %v188_v23 = vpop.xlane.xlu1 %187  ;;  %v180_v24 = vpop.xlane.xlu0 %179 }
  0xa5   : > { %v214_v25 = vrot.slane %v188_v23, %v200_v20  ;;  %v182_v26 = vmul.f32 0.00390625, %v180_v24 }
  0xa7   : > { %v201_v29 = vrot.slane %v182_v26, %v200_v20  ;;  %v215_v30 = vsel %vm202_vm4, %v214_v25, %v210_v27 }
  0xa9   : > { %v203_v31 = vsel %vm202_vm4, %v201_v29, %v196_v28 }
  0xaa   : > { %v218_v32 = vsel %vm217_vm5, %v203_v31, %v215_v30 }
  0xab   : > { %491 = vmatmul.mubr.msk.f32.vlgmr.msra.gmra.mrb[0].mxu0 %vm222_vm0, %v218_v32 }
 0x17e   : > { %v295_v33 = vpop.f32.mrb[0].mxu0 }
 0x17f   : > { %v299_v34 = vmax.f32 %v295_v33, 0.0  ;;  %v492_v35 = vpop.f32.mrb[1].mxu0 }
 0x181   : > { %498 = vmatmul.mubr.msk.f32.vlgmr.msra.gmra.mrb[0].mxu1 %vm300_vm2, %v299_v34 }
 0x254   : > { %v376_v36 = vpop.f32.mrb[0].mxu1 }
 0x255   : > { %v381_v37 = vrot.slane %v376_v36, 1  ;;  %v499_v38 = vpop.f32.mrb[1].mxu1 }
 0x257   : > { %v383_v39 = vadd.f32 %v381_v37, %v376_v36 }
 0x259   : > { %v478_v40 = vmul.f32 -1.442695, %v383_v39 }
 0x25b   : > { %515 = vpow2.f32 %v478_v40 }
 0x265   : > { %v516_v41 = vpop.eup %515 }
 0x266   : > { %v387_v42 = vadd.f32 1.0, %v516_v41 }
 0x268   : > { %517 = vrcp.f32 %v387_v42 }
 0x272   : > { %v518_v44 = vpop.eup %517 }
 0x273   : > { %v393_v45 = vrot.slane %v518_v44, %v392_v43 }
 0x275   : > { %399 = vbcast.lane.b32.xlu1 %v393_v45, 264  ;;  %395 = vbcast.lane.b32.xlu0 %v393_v45, 256 }
 0x2e7   : > { %v400_v46 = vpop.permute.xlu1 %399  ;;  %v396_v47 = vpop.permute.xlu0 %395 }
 0x2e8   : > { %v403_v48 = vmul.f32 %v400_v46, %v570_v2  ;;  %v404_v49 = vmul.f32 %v400_v46, %v576_v5  ;;  %v401_v50 = vmul.f32 %v396_v47, %v566_v0  ;;  %v402_v51 = vmul.f32 %v396_v47, %v568_v1 }
 0x2ea   : > { %407 = vst [vmem:[%s170_s26 + $0x10] sm:$0xff] %v403_v48  ;;  %408 = vst [vmem:[%s170_s26 + $0x18] sm:$0xff] %v404_v49 }
 0x2eb   : > { %405 = vst [vmem:[%s170_s26] sm:$0xff] %v401_v50  ;;  %406 = vst [vmem:[%s170_s26 + $0x8] sm:$0xff] %v402_v51 }
 0x2ec PF: > { %s13_s12 = sadd.s32 1, %s525_s12  }
 0x2ed   : > { %p10_p4 = scmp.ge.s32.totalorder %s13_s12, 4  }
 0x2ef   :  { %12 = sbr.rel (!%p10_p4) target bundleno = 1 (0x1), region = 62 }

</bundles_post_ra>
